<compile_context>
chip_gen: v5e
topology: v5e:2x2
jax: 0.10.0
libtpu: 0.0.40
codegen_flags: <defaults>
</compile_context>

<pallas_src>
import functools

import jax
import jax.numpy as jnp
from jax import lax
from jax.experimental import pallas as pl
from jax.experimental.pallas import tpu as pltpu


def _round_up(n, m):
    return ((n + m - 1) // m) * m


def _vmem_capacity_bytes():
    """Best-effort query of per-core VMEM; conservative fallback if unavailable."""
    try:
        return int(pltpu.get_tpu_info().vmem_capacity_bytes)
    except Exception:
        return 64 * 1024 * 1024


# --------------------------------------------------------------------------- #
# Kernel 1: QKV projection  x (B,N,C) -> q,k,v (B,H,N,D)  (scale folded in Wq)
# --------------------------------------------------------------------------- #
def _qkv_proj_kernel(x_ref, wq_ref, wk_ref, wv_ref, q_ref, k_ref, v_ref, *,
                     num_heads):
    xb = x_ref[0]                                   # (T, C), x.dtype
    dn = (((1,), (1,)), ((), ()))                   # contract last dims (no transpose)
    for h in range(num_heads):                      # static unroll; weights VMEM-resident
        q_ref[0, h] = lax.dot_general(
            xb, wq_ref[h], dn, preferred_element_type=jnp.float32
        ).astype(q_ref.dtype)
        k_ref[0, h] = lax.dot_general(
            xb, wk_ref[h], dn, preferred_element_type=jnp.float32
        ).astype(k_ref.dtype)
        v_ref[0, h] = lax.dot_general(
            xb, wv_ref[h], dn, preferred_element_type=jnp.float32
        ).astype(v_ref.dtype)


# --------------------------------------------------------------------------- #
# Kernel 2: flash attention + fused output projection (+ bias)
# --------------------------------------------------------------------------- #
def _flash_attn_kernel(q_ref, k_ref, v_ref, wo_ref, b_ref, o_ref,
                       m_sc, l_sc, acc_sc, y_sc, *, seq_len, tkv, need_mask):
    # grid = (batch, q_tile, head, kv_tile)
    h = pl.program_id(2)
    kv = pl.program_id(3)
    last_h = pl.num_programs(2) - 1
    last_kv = pl.num_programs(3) - 1

    # Init fused-projection accumulator once per (batch, q_tile).
    @pl.when(jnp.logical_and(h == 0, kv == 0))
    def _init_proj_acc():
        y_sc[...] = jnp.zeros_like(y_sc)

    # Start of a head: reset online-softmax state.
    @pl.when(kv == 0)
    def _start_head():
        m_sc[...] = jnp.full_like(m_sc, -jnp.inf)
        l_sc[...] = jnp.zeros_like(l_sc)
        acc_sc[...] = jnp.zeros_like(acc_sc)

    q = q_ref[0, 0]                                 # (TQ, D), x.dtype (scale pre-folded)
    k = k_ref[0, 0]                                 # (TKV, D), x.dtype
    v = v_ref[0, 0]                                 # (TKV, D), x.dtype

    # Scores: contract last dims (no explicit transpose); fp32 accumulate, native
    # operand dtype (bf16 MXU path when the model is bf16).
    s = lax.dot_general(q, k, (((1,), (1,)), ((), ())),
                        preferred_element_type=jnp.float32)      # (TQ, TKV)

    if need_mask:  # static: only traced when N was padded
        col = kv * tkv + lax.broadcasted_iota(jnp.int32, s.shape, 1)
        s = jnp.where(col < seq_len, s, -jnp.inf)

    # Online softmax update (fp32 state).
    m_prev = m_sc[...]
    m_new = jnp.maximum(m_prev, jnp.max(s, axis=-1, keepdims=True))
    alpha = jnp.exp(m_prev - m_new)
    p = jnp.exp(s - m_new)
    l_sc[...] = alpha * l_sc[...] + jnp.sum(p, axis=-1, keepdims=True)
    acc_sc[...] = alpha * acc_sc[...] + jnp.dot(
        p.astype(v.dtype), v, preferred_element_type=jnp.float32)
    m_sc[...] = m_new

    # End of a head: normalize and fuse the output projection as a per-head
    # accumulation into the (TQ, C) scratch (no (N, C) intermediate / concat).
    @pl.when(kv == last_kv)
    def _finish_head():
        head_out = acc_sc[...] * pl.reciprocal(l_sc[...], approx=True)   # (TQ, D) f32
        y_sc[...] += jnp.dot(head_out.astype(v.dtype), wo_ref[h],
                             preferred_element_type=jnp.float32)         # (TQ, C)

    # Final step for this output tile: add bias and store (lane-dense, C-wide).
    @pl.when(jnp.logical_and(h == last_h, kv == last_kv))
    def _write_out():
        o_ref[0] = (y_sc[...] + b_ref[...]).astype(o_ref.dtype)


# --------------------------------------------------------------------------- #
# Wrapper
# --------------------------------------------------------------------------- #
def attention_forward(x, wqkv, wproj, bproj, *, num_heads):
    """x: (B, N, C). wqkv: (3C, C) torch layout. wproj: (C, C). bproj: (C,)."""
    B, N, C = x.shape
    H = max(num_heads, 1)
    assert C % H == 0, "dim should be divisible by num_heads"
    D = C // H
    scale = D ** -0.5
    dtype = x.dtype

    # --- parameter prep (done once; hoist to param-prep time in a real model) ---
    # qkv weight: no transpose needed — kernels contract over its last (C) dim.
    w3 = wqkv.reshape(3, H, D, C).astype(dtype)
    wq = w3[0] * jnp.asarray(scale, dtype)          # fold softmax scale into Wq (exact:
    wk, wv = w3[1], w3[2]                           # qkv_bias=False)
    # Output-proj weight: head h's (D, C) slab so y += head_h @ wo[h].
    wo = jnp.transpose(wproj, (1, 0)).reshape(H, D, C).astype(dtype)
    b2 = bproj.reshape(1, C)

    # --- generation-aware tiling / VMEM budget ---
    vmem_cap = _vmem_capacity_bytes()
    if vmem_cap >= 96 * (1 << 20):                  # v5e / v6e class (128 MiB VMEM)
        target_t, vmem_limit = 512, 80 * (1 << 20)
    else:                                           # v7x (64 MiB) / unknown
        target_t, vmem_limit = 256, 40 * (1 << 20)

    sub = 16 if jnp.dtype(dtype).itemsize < 4 else 8    # sublane multiple
    T = target_t if N >= target_t else _round_up(N, sub)
    N_pad = _round_up(N, T)
    need_mask = N_pad != N
    xp = x if not need_mask else jnp.pad(x, ((0, 0), (0, N_pad - N), (0, 0)))
    nt = N_pad // T

    # --- kernel 1: QKV projection -> q, k, v as (B, H, N_pad, D) in x.dtype ---
    q, k, v = pl.pallas_call(
        functools.partial(_qkv_proj_kernel, num_heads=H),
        out_shape=(jax.ShapeDtypeStruct((B, H, N_pad, D), dtype),
                   jax.ShapeDtypeStruct((B, H, N_pad, D), dtype),
                   jax.ShapeDtypeStruct((B, H, N_pad, D), dtype)),
        grid_spec=pltpu.PrefetchScalarGridSpec(
            num_scalar_prefetch=0,
            grid=(B, nt),
            in_specs=[
                pl.BlockSpec((1, T, C), lambda b, i: (b, i, 0)),
                # Full, VMEM-resident per-head weight slabs (constant index_map).
                pl.BlockSpec((H, D, C), lambda b, i: (0, 0, 0)),
                pl.BlockSpec((H, D, C), lambda b, i: (0, 0, 0)),
                pl.BlockSpec((H, D, C), lambda b, i: (0, 0, 0)),
            ],
            out_specs=[
                pl.BlockSpec((1, H, T, D), lambda b, i: (b, 0, i, 0)),
                pl.BlockSpec((1, H, T, D), lambda b, i: (b, 0, i, 0)),
                pl.BlockSpec((1, H, T, D), lambda b, i: (b, 0, i, 0)),
            ]),
        compiler_params=pltpu.CompilerParams(
            dimension_semantics=("parallel", "parallel"),
            vmem_limit_bytes=vmem_limit),
    )(xp, wq, wk, wv)

    # --- kernel 2: flash attention + fused output projection + bias ---
    kernel = functools.partial(_flash_attn_kernel,
                               seq_len=N, tkv=T, need_mask=need_mask)
    out = pl.pallas_call(
        kernel,
        out_shape=jax.ShapeDtypeStruct((B, N_pad, C), dtype),
        grid_spec=pltpu.PrefetchScalarGridSpec(
            num_scalar_prefetch=0,
            grid=(B, nt, H, nt),
            in_specs=[
                # Q tile: resident across the kv accumulation axis.
                pl.BlockSpec((1, 1, T, D), lambda b, qi, h, kv: (b, h, qi, 0)),
                # K / V tiles: streamed per kv step.
                pl.BlockSpec((1, 1, T, D), lambda b, qi, h, kv: (b, h, kv, 0)),
                pl.BlockSpec((1, 1, T, D), lambda b, qi, h, kv: (b, h, kv, 0)),
                # Output-projection weight: fully VMEM-resident, sliced per head
                # in-kernel (cheap leading-dim slice) -> no per-head re-DMA.
                pl.BlockSpec((H, D, C), lambda b, qi, h, kv: (0, 0, 0)),
                # Projection bias.
                pl.BlockSpec((1, C), lambda b, qi, h, kv: (0, 0)),
            ],
            out_specs=pl.BlockSpec((1, T, C), lambda b, qi, h, kv: (b, qi, 0)),
            scratch_shapes=[
                pltpu.VMEM((T, 1), jnp.float32),    # running max m
                pltpu.VMEM((T, 1), jnp.float32),    # running sum l
                pltpu.VMEM((T, D), jnp.float32),    # attention accumulator
                pltpu.VMEM((T, C), jnp.float32),    # fused proj accumulator
            ]),
        compiler_params=pltpu.CompilerParams(
            dimension_semantics=("parallel", "parallel", "arbitrary", "arbitrary"),
            vmem_limit_bytes=vmem_limit),
    )(q, k, v, wo, b2)

    return out if not need_mask else out[:, :N, :]


# --------------------------------------------------------------------------- #
# Pure-JAX reference (matches the PyTorch module forward)
# --------------------------------------------------------------------------- #
def _reference(x, wqkv, wproj, bproj, *, num_heads):
    B, N, C = x.shape
    D = C // num_heads
    scale = D ** -0.5
    qkv = jnp.einsum('bnc,oc->bno', x, wqkv)                    # (B, N, 3C)
    qkv = qkv.reshape(B, N, 3, num_heads, D).transpose(2, 0, 3, 1, 4)
    q, k, v = qkv[0], qkv[1], qkv[2]                            # (B, H, N, D)
    attn = jnp.einsum('bhnd,bhmd->bhnm', q * scale, k)
    attn = jax.nn.softmax(attn, axis=-1)
    out = jnp.einsum('bhnm,bhmd->bhnd', attn, v)
    out = out.transpose(0, 2, 1, 3).reshape(B, N, C)
    return jnp.einsum('bnc,oc->bno', out, wproj) + bproj


if __name__ == "__main__":
    B, N, C = 2, 8, 32
    num_heads = 4

    key = jax.random.PRNGKey(0)
    kx, kq, kp, kb = jax.random.split(key, 4)
    x = jax.random.normal(kx, (B, N, C), dtype=jnp.float32)
    # Deterministic "init" of module parameters (qkv_bias=False -> no qkv bias).
    wqkv = jax.random.normal(kq, (3 * C, C), dtype=jnp.float32) * 0.05
    wproj = jax.random.normal(kp, (C, C), dtype=jnp.float32) * 0.05
    bproj = jax.random.normal(kb, (C,), dtype=jnp.float32) * 0.05

    out = attention_forward(x, wqkv, wproj, bproj, num_heads=num_heads)
    out = jax.block_until_ready(out)

    ref = _reference(x, wqkv, wproj, bproj, num_heads=num_heads)
    # Slightly relaxed tolerance: pl.reciprocal(approx=True) in softmax norm.
    assert jnp.allclose(out, ref, atol=2e-3, rtol=2e-3), "mismatch vs reference"

    print("KERNEL_OK")
</pallas_src>

<mosaic_0001>
module attributes {stable_mosaic.version = 11 : i64} {
  func.func @_qkv_proj_kernel(%arg0: i32, %arg1: i32, %arg2: memref<1x8x32xf32, #tpu.memory_space<vmem>>, %arg3: memref<4x8x32xf32, #tpu.memory_space<vmem>>, %arg4: memref<4x8x32xf32, #tpu.memory_space<vmem>>, %arg5: memref<4x8x32xf32, #tpu.memory_space<vmem>>, %arg6: memref<1x4x8x8xf32, #tpu.memory_space<vmem>>, %arg7: memref<1x4x8x8xf32, #tpu.memory_space<vmem>>, %arg8: memref<1x4x8x8xf32, #tpu.memory_space<vmem>>) attributes {dimension_semantics = [#tpu.dimension_semantics<parallel>, #tpu.dimension_semantics<parallel>], iteration_bounds = array<i64: 2, 1>, scalar_prefetch = 0 : i64, scratch_operands = 0 : i64, tpu.core_type = #tpu.core_type<tc>, window_params = [{transform_indices = @transform_0, window_bounds = array<i64: 1, 8, 32>}, {pipeline_mode = #tpu.pipeline_mode<synchronous>, transform_indices = @transform_1, window_bounds = array<i64: 4, 8, 32>}, {pipeline_mode = #tpu.pipeline_mode<synchronous>, transform_indices = @transform_2, window_bounds = array<i64: 4, 8, 32>}, {pipeline_mode = #tpu.pipeline_mode<synchronous>, transform_indices = @transform_3, window_bounds = array<i64: 4, 8, 32>}, {transform_indices = @transform_4, window_bounds = array<i64: 1, 4, 8, 8>}, {transform_indices = @transform_5, window_bounds = array<i64: 1, 4, 8, 8>}, {transform_indices = @transform_6, window_bounds = array<i64: 1, 4, 8, 8>}]} {
    %c0 = arith.constant 0 : index
    %c0_0 = arith.constant 0 : index
    %c0_1 = arith.constant 0 : index
    %0 = vector.load %arg2[%c0, %c0_0, %c0_1] : memref<1x8x32xf32, #tpu.memory_space<vmem>>, vector<1x8x32xf32>
    %1 = vector.shape_cast %0 : vector<1x8x32xf32> to vector<8x32xf32>
    %c0_2 = arith.constant 0 : index
    %c0_3 = arith.constant 0 : index
    %c0_4 = arith.constant 0 : index
    %2 = vector.load %arg3[%c0_2, %c0_3, %c0_4] : memref<4x8x32xf32, #tpu.memory_space<vmem>>, vector<1x8x32xf32>
    %3 = vector.shape_cast %2 : vector<1x8x32xf32> to vector<8x32xf32>
    %cst = arith.constant dense<0.000000e+00> : vector<8x8xf32>
    %4 = tpu.matmul %1, %3, %cst {dimension_numbers = #tpu.dot_dimension_numbers<[1], [1], [0], [0], [0, 0, 1, 0], [], []>} : vector<8x32xf32>, vector<8x32xf32>, vector<8x8xf32> -> vector<8x8xf32>
    %c0_5 = arith.constant 0 : index
    %c0_6 = arith.constant 0 : index
    %c0_7 = arith.constant 0 : index
    %c0_8 = arith.constant 0 : index
    %5 = vector.load %arg6[%c0_5, %c0_6, %c0_7, %c0_8] : memref<1x4x8x8xf32, #tpu.memory_space<vmem>>, vector<1x1x8x8xf32>
    %6 = vector.shape_cast %5 : vector<1x1x8x8xf32> to vector<8x8xf32>
    %7 = vector.shape_cast %4 : vector<8x8xf32> to vector<1x1x8x8xf32>
    tpu.vector_store %arg6[%c0_5, %c0_6, %c0_7, %c0_8], %7 {strides = array<i32>} : memref<1x4x8x8xf32, #tpu.memory_space<vmem>>, vector<1x1x8x8xf32>,
    %c0_9 = arith.constant 0 : index
    %c0_10 = arith.constant 0 : index
    %c0_11 = arith.constant 0 : index
    %8 = vector.load %arg4[%c0_9, %c0_10, %c0_11] : memref<4x8x32xf32, #tpu.memory_space<vmem>>, vector<1x8x32xf32>
    %9 = vector.shape_cast %8 : vector<1x8x32xf32> to vector<8x32xf32>
    %cst_12 = arith.constant dense<0.000000e+00> : vector<8x8xf32>
    %10 = tpu.matmul %1, %9, %cst_12 {dimension_numbers = #tpu.dot_dimension_numbers<[1], [1], [0], [0], [0, 0, 1, 0], [], []>} : vector<8x32xf32>, vector<8x32xf32>, vector<8x8xf32> -> vector<8x8xf32>
    %c0_13 = arith.constant 0 : index
    %c0_14 = arith.constant 0 : index
    %c0_15 = arith.constant 0 : index
    %c0_16 = arith.constant 0 : index
    %11 = vector.load %arg7[%c0_13, %c0_14, %c0_15, %c0_16] : memref<1x4x8x8xf32, #tpu.memory_space<vmem>>, vector<1x1x8x8xf32>
    %12 = vector.shape_cast %11 : vector<1x1x8x8xf32> to vector<8x8xf32>
    %13 = vector.shape_cast %10 : vector<8x8xf32> to vector<1x1x8x8xf32>
    tpu.vector_store %arg7[%c0_13, %c0_14, %c0_15, %c0_16], %13 {strides = array<i32>} : memref<1x4x8x8xf32, #tpu.memory_space<vmem>>, vector<1x1x8x8xf32>,
    %c0_17 = arith.constant 0 : index
    %c0_18 = arith.constant 0 : index
    %c0_19 = arith.constant 0 : index
    %14 = vector.load %arg5[%c0_17, %c0_18, %c0_19] : memref<4x8x32xf32, #tpu.memory_space<vmem>>, vector<1x8x32xf32>
    %15 = vector.shape_cast %14 : vector<1x8x32xf32> to vector<8x32xf32>
    %cst_20 = arith.constant dense<0.000000e+00> : vector<8x8xf32>
    %16 = tpu.matmul %1, %15, %cst_20 {dimension_numbers = #tpu.dot_dimension_numbers<[1], [1], [0], [0], [0, 0, 1, 0], [], []>} : vector<8x32xf32>, vector<8x32xf32>, vector<8x8xf32> -> vector<8x8xf32>
    %c0_21 = arith.constant 0 : index
    %c0_22 = arith.constant 0 : index
    %c0_23 = arith.constant 0 : index
    %c0_24 = arith.constant 0 : index
    %17 = vector.load %arg8[%c0_21, %c0_22, %c0_23, %c0_24] : memref<1x4x8x8xf32, #tpu.memory_space<vmem>>, vector<1x1x8x8xf32>
    %18 = vector.shape_cast %17 : vector<1x1x8x8xf32> to vector<8x8xf32>
    %19 = vector.shape_cast %16 : vector<8x8xf32> to vector<1x1x8x8xf32>
    tpu.vector_store %arg8[%c0_21, %c0_22, %c0_23, %c0_24], %19 {strides = array<i32>} : memref<1x4x8x8xf32, #tpu.memory_space<vmem>>, vector<1x1x8x8xf32>,
    %c1 = arith.constant 1 : index
    %c0_25 = arith.constant 0 : index
    %c0_26 = arith.constant 0 : index
    %20 = vector.load %arg3[%c1, %c0_25, %c0_26] : memref<4x8x32xf32, #tpu.memory_space<vmem>>, vector<1x8x32xf32>
    %21 = vector.shape_cast %20 : vector<1x8x32xf32> to vector<8x32xf32>
    %cst_27 = arith.constant dense<0.000000e+00> : vector<8x8xf32>
    %22 = tpu.matmul %1, %21, %cst_27 {dimension_numbers = #tpu.dot_dimension_numbers<[1], [1], [0], [0], [0, 0, 1, 0], [], []>} : vector<8x32xf32>, vector<8x32xf32>, vector<8x8xf32> -> vector<8x8xf32>
    %c0_28 = arith.constant 0 : index
    %c1_29 = arith.constant 1 : index
    %c0_30 = arith.constant 0 : index
    %c0_31 = arith.constant 0 : index
    %23 = vector.load %arg6[%c0_28, %c1_29, %c0_30, %c0_31] : memref<1x4x8x8xf32, #tpu.memory_space<vmem>>, vector<1x1x8x8xf32>
    %24 = vector.shape_cast %23 : vector<1x1x8x8xf32> to vector<8x8xf32>
    %25 = vector.shape_cast %22 : vector<8x8xf32> to vector<1x1x8x8xf32>
    tpu.vector_store %arg6[%c0_28, %c1_29, %c0_30, %c0_31], %25 {strides = array<i32>} : memref<1x4x8x8xf32, #tpu.memory_space<vmem>>, vector<1x1x8x8xf32>,
    %c1_32 = arith.constant 1 : index
    %c0_33 = arith.constant 0 : index
    %c0_34 = arith.constant 0 : index
    %26 = vector.load %arg4[%c1_32, %c0_33, %c0_34] : memref<4x8x32xf32, #tpu.memory_space<vmem>>, vector<1x8x32xf32>
    %27 = vector.shape_cast %26 : vector<1x8x32xf32> to vector<8x32xf32>
    %cst_35 = arith.constant dense<0.000000e+00> : vector<8x8xf32>
    %28 = tpu.matmul %1, %27, %cst_35 {dimension_numbers = #tpu.dot_dimension_numbers<[1], [1], [0], [0], [0, 0, 1, 0], [], []>} : vector<8x32xf32>, vector<8x32xf32>, vector<8x8xf32> -> vector<8x8xf32>
    %c0_36 = arith.constant 0 : index
    %c1_37 = arith.constant 1 : index
    %c0_38 = arith.constant 0 : index
    %c0_39 = arith.constant 0 : index
    %29 = vector.load %arg7[%c0_36, %c1_37, %c0_38, %c0_39] : memref<1x4x8x8xf32, #tpu.memory_space<vmem>>, vector<1x1x8x8xf32>
    %30 = vector.shape_cast %29 : vector<1x1x8x8xf32> to vector<8x8xf32>
    %31 = vector.shape_cast %28 : vector<8x8xf32> to vector<1x1x8x8xf32>
    tpu.vector_store %arg7[%c0_36, %c1_37, %c0_38, %c0_39], %31 {strides = array<i32>} : memref<1x4x8x8xf32, #tpu.memory_space<vmem>>, vector<1x1x8x8xf32>,
    %c1_40 = arith.constant 1 : index
    %c0_41 = arith.constant 0 : index
    %c0_42 = arith.constant 0 : index
    %32 = vector.load %arg5[%c1_40, %c0_41, %c0_42] : memref<4x8x32xf32, #tpu.memory_space<vmem>>, vector<1x8x32xf32>
    %33 = vector.shape_cast %32 : vector<1x8x32xf32> to vector<8x32xf32>
    %cst_43 = arith.constant dense<0.000000e+00> : vector<8x8xf32>
    %34 = tpu.matmul %1, %33, %cst_43 {dimension_numbers = #tpu.dot_dimension_numbers<[1], [1], [0], [0], [0, 0, 1, 0], [], []>} : vector<8x32xf32>, vector<8x32xf32>, vector<8x8xf32> -> vector<8x8xf32>
    %c0_44 = arith.constant 0 : index
    %c1_45 = arith.constant 1 : index
    %c0_46 = arith.constant 0 : index
    %c0_47 = arith.constant 0 : index
    %35 = vector.load %arg8[%c0_44, %c1_45, %c0_46, %c0_47] : memref<1x4x8x8xf32, #tpu.memory_space<vmem>>, vector<1x1x8x8xf32>
    %36 = vector.shape_cast %35 : vector<1x1x8x8xf32> to vector<8x8xf32>
    %37 = vector.shape_cast %34 : vector<8x8xf32> to vector<1x1x8x8xf32>
    tpu.vector_store %arg8[%c0_44, %c1_45, %c0_46, %c0_47], %37 {strides = array<i32>} : memref<1x4x8x8xf32, #tpu.memory_space<vmem>>, vector<1x1x8x8xf32>,
    %c2 = arith.constant 2 : index
    %c0_48 = arith.constant 0 : index
    %c0_49 = arith.constant 0 : index
    %38 = vector.load %arg3[%c2, %c0_48, %c0_49] : memref<4x8x32xf32, #tpu.memory_space<vmem>>, vector<1x8x32xf32>
    %39 = vector.shape_cast %38 : vector<1x8x32xf32> to vector<8x32xf32>
    %cst_50 = arith.constant dense<0.000000e+00> : vector<8x8xf32>
    %40 = tpu.matmul %1, %39, %cst_50 {dimension_numbers = #tpu.dot_dimension_numbers<[1], [1], [0], [0], [0, 0, 1, 0], [], []>} : vector<8x32xf32>, vector<8x32xf32>, vector<8x8xf32> -> vector<8x8xf32>
    %c0_51 = arith.constant 0 : index
    %c2_52 = arith.constant 2 : index
    %c0_53 = arith.constant 0 : index
    %c0_54 = arith.constant 0 : index
    %41 = vector.load %arg6[%c0_51, %c2_52, %c0_53, %c0_54] : memref<1x4x8x8xf32, #tpu.memory_space<vmem>>, vector<1x1x8x8xf32>
    %42 = vector.shape_cast %41 : vector<1x1x8x8xf32> to vector<8x8xf32>
    %43 = vector.shape_cast %40 : vector<8x8xf32> to vector<1x1x8x8xf32>
    tpu.vector_store %arg6[%c0_51, %c2_52, %c0_53, %c0_54], %43 {strides = array<i32>} : memref<1x4x8x8xf32, #tpu.memory_space<vmem>>, vector<1x1x8x8xf32>,
    %c2_55 = arith.constant 2 : index
    %c0_56 = arith.constant 0 : index
    %c0_57 = arith.constant 0 : index
    %44 = vector.load %arg4[%c2_55, %c0_56, %c0_57] : memref<4x8x32xf32, #tpu.memory_space<vmem>>, vector<1x8x32xf32>
    %45 = vector.shape_cast %44 : vector<1x8x32xf32> to vector<8x32xf32>
    %cst_58 = arith.constant dense<0.000000e+00> : vector<8x8xf32>
    %46 = tpu.matmul %1, %45, %cst_58 {dimension_numbers = #tpu.dot_dimension_numbers<[1], [1], [0], [0], [0, 0, 1, 0], [], []>} : vector<8x32xf32>, vector<8x32xf32>, vector<8x8xf32> -> vector<8x8xf32>
    %c0_59 = arith.constant 0 : index
    %c2_60 = arith.constant 2 : index
    %c0_61 = arith.constant 0 : index
    %c0_62 = arith.constant 0 : index
    %47 = vector.load %arg7[%c0_59, %c2_60, %c0_61, %c0_62] : memref<1x4x8x8xf32, #tpu.memory_space<vmem>>, vector<1x1x8x8xf32>
    %48 = vector.shape_cast %47 : vector<1x1x8x8xf32> to vector<8x8xf32>
    %49 = vector.shape_cast %46 : vector<8x8xf32> to vector<1x1x8x8xf32>
    tpu.vector_store %arg7[%c0_59, %c2_60, %c0_61, %c0_62], %49 {strides = array<i32>} : memref<1x4x8x8xf32, #tpu.memory_space<vmem>>, vector<1x1x8x8xf32>,
    %c2_63 = arith.constant 2 : index
    %c0_64 = arith.constant 0 : index
    %c0_65 = arith.constant 0 : index
    %50 = vector.load %arg5[%c2_63, %c0_64, %c0_65] : memref<4x8x32xf32, #tpu.memory_space<vmem>>, vector<1x8x32xf32>
    %51 = vector.shape_cast %50 : vector<1x8x32xf32> to vector<8x32xf32>
    %cst_66 = arith.constant dense<0.000000e+00> : vector<8x8xf32>
    %52 = tpu.matmul %1, %51, %cst_66 {dimension_numbers = #tpu.dot_dimension_numbers<[1], [1], [0], [0], [0, 0, 1, 0], [], []>} : vector<8x32xf32>, vector<8x32xf32>, vector<8x8xf32> -> vector<8x8xf32>
    %c0_67 = arith.constant 0 : index
    %c2_68 = arith.constant 2 : index
    %c0_69 = arith.constant 0 : index
    %c0_70 = arith.constant 0 : index
    %53 = vector.load %arg8[%c0_67, %c2_68, %c0_69, %c0_70] : memref<1x4x8x8xf32, #tpu.memory_space<vmem>>, vector<1x1x8x8xf32>
    %54 = vector.shape_cast %53 : vector<1x1x8x8xf32> to vector<8x8xf32>
    %55 = vector.shape_cast %52 : vector<8x8xf32> to vector<1x1x8x8xf32>
    tpu.vector_store %arg8[%c0_67, %c2_68, %c0_69, %c0_70], %55 {strides = array<i32>} : memref<1x4x8x8xf32, #tpu.memory_space<vmem>>, vector<1x1x8x8xf32>,
    %c3 = arith.constant 3 : index
    %c0_71 = arith.constant 0 : index
    %c0_72 = arith.constant 0 : index
    %56 = vector.load %arg3[%c3, %c0_71, %c0_72] : memref<4x8x32xf32, #tpu.memory_space<vmem>>, vector<1x8x32xf32>
    %57 = vector.shape_cast %56 : vector<1x8x32xf32> to vector<8x32xf32>
    %cst_73 = arith.constant dense<0.000000e+00> : vector<8x8xf32>
    %58 = tpu.matmul %1, %57, %cst_73 {dimension_numbers = #tpu.dot_dimension_numbers<[1], [1], [0], [0], [0, 0, 1, 0], [], []>} : vector<8x32xf32>, vector<8x32xf32>, vector<8x8xf32> -> vector<8x8xf32>
    %c0_74 = arith.constant 0 : index
    %c3_75 = arith.constant 3 : index
    %c0_76 = arith.constant 0 : index
    %c0_77 = arith.constant 0 : index
    %59 = vector.load %arg6[%c0_74, %c3_75, %c0_76, %c0_77] : memref<1x4x8x8xf32, #tpu.memory_space<vmem>>, vector<1x1x8x8xf32>
    %60 = vector.shape_cast %59 : vector<1x1x8x8xf32> to vector<8x8xf32>
    %61 = vector.shape_cast %58 : vector<8x8xf32> to vector<1x1x8x8xf32>
    tpu.vector_store %arg6[%c0_74, %c3_75, %c0_76, %c0_77], %61 {strides = array<i32>} : memref<1x4x8x8xf32, #tpu.memory_space<vmem>>, vector<1x1x8x8xf32>,
    %c3_78 = arith.constant 3 : index
    %c0_79 = arith.constant 0 : index
    %c0_80 = arith.constant 0 : index
    %62 = vector.load %arg4[%c3_78, %c0_79, %c0_80] : memref<4x8x32xf32, #tpu.memory_space<vmem>>, vector<1x8x32xf32>
    %63 = vector.shape_cast %62 : vector<1x8x32xf32> to vector<8x32xf32>
    %cst_81 = arith.constant dense<0.000000e+00> : vector<8x8xf32>
    %64 = tpu.matmul %1, %63, %cst_81 {dimension_numbers = #tpu.dot_dimension_numbers<[1], [1], [0], [0], [0, 0, 1, 0], [], []>} : vector<8x32xf32>, vector<8x32xf32>, vector<8x8xf32> -> vector<8x8xf32>
    %c0_82 = arith.constant 0 : index
    %c3_83 = arith.constant 3 : index
    %c0_84 = arith.constant 0 : index
    %c0_85 = arith.constant 0 : index
    %65 = vector.load %arg7[%c0_82, %c3_83, %c0_84, %c0_85] : memref<1x4x8x8xf32, #tpu.memory_space<vmem>>, vector<1x1x8x8xf32>
    %66 = vector.shape_cast %65 : vector<1x1x8x8xf32> to vector<8x8xf32>
    %67 = vector.shape_cast %64 : vector<8x8xf32> to vector<1x1x8x8xf32>
    tpu.vector_store %arg7[%c0_82, %c3_83, %c0_84, %c0_85], %67 {strides = array<i32>} : memref<1x4x8x8xf32, #tpu.memory_space<vmem>>, vector<1x1x8x8xf32>,
    %c3_86 = arith.constant 3 : index
    %c0_87 = arith.constant 0 : index
    %c0_88 = arith.constant 0 : index
    %68 = vector.load %arg5[%c3_86, %c0_87, %c0_88] : memref<4x8x32xf32, #tpu.memory_space<vmem>>, vector<1x8x32xf32>
    %69 = vector.shape_cast %68 : vector<1x8x32xf32> to vector<8x32xf32>
    %cst_89 = arith.constant dense<0.000000e+00> : vector<8x8xf32>
    %70 = tpu.matmul %1, %69, %cst_89 {dimension_numbers = #tpu.dot_dimension_numbers<[1], [1], [0], [0], [0, 0, 1, 0], [], []>} : vector<8x32xf32>, vector<8x32xf32>, vector<8x8xf32> -> vector<8x8xf32>
    %c0_90 = arith.constant 0 : index
    %c3_91 = arith.constant 3 : index
    %c0_92 = arith.constant 0 : index
    %c0_93 = arith.constant 0 : index
    %71 = vector.load %arg8[%c0_90, %c3_91, %c0_92, %c0_93] : memref<1x4x8x8xf32, #tpu.memory_space<vmem>>, vector<1x1x8x8xf32>
    %72 = vector.shape_cast %71 : vector<1x1x8x8xf32> to vector<8x8xf32>
    %73 = vector.shape_cast %70 : vector<8x8xf32> to vector<1x1x8x8xf32>
    tpu.vector_store %arg8[%c0_90, %c3_91, %c0_92, %c0_93], %73 {strides = array<i32>} : memref<1x4x8x8xf32, #tpu.memory_space<vmem>>, vector<1x1x8x8xf32>,
    return
  }
  func.func @transform_0(%arg0: i32, %arg1: i32) -> (i32, i32, i32) {
    %c0_i32 = arith.constant 0 : i32
    %c0_i32_0 = arith.constant 0 : i32
    return %arg0, %arg1, %c0_i32 : i32, i32, i32
  }
  func.func @transform_1(%arg0: i32, %arg1: i32) -> (i32, i32, i32) {
    %c0_i32 = arith.constant 0 : i32
    %c0_i32_0 = arith.constant 0 : i32
    %c0_i32_1 = arith.constant 0 : i32
    %c0_i32_2 = arith.constant 0 : i32
    return %c0_i32, %c0_i32_0, %c0_i32_1 : i32, i32, i32
  }
  func.func @transform_2(%arg0: i32, %arg1: i32) -> (i32, i32, i32) {
    %c0_i32 = arith.constant 0 : i32
    %c0_i32_0 = arith.constant 0 : i32
    %c0_i32_1 = arith.constant 0 : i32
    %c0_i32_2 = arith.constant 0 : i32
    return %c0_i32, %c0_i32_0, %c0_i32_1 : i32, i32, i32
  }
  func.func @transform_3(%arg0: i32, %arg1: i32) -> (i32, i32, i32) {
    %c0_i32 = arith.constant 0 : i32
    %c0_i32_0 = arith.constant 0 : i32
    %c0_i32_1 = arith.constant 0 : i32
    %c0_i32_2 = arith.constant 0 : i32
    return %c0_i32, %c0_i32_0, %c0_i32_1 : i32, i32, i32
  }
  func.func @transform_4(%arg0: i32, %arg1: i32) -> (i32, i32, i32, i32) {
    %c0_i32 = arith.constant 0 : i32
    %c0_i32_0 = arith.constant 0 : i32
    %c0_i32_1 = arith.constant 0 : i32
    return %arg0, %c0_i32, %arg1, %c0_i32_0 : i32, i32, i32, i32
  }
  func.func @transform_5(%arg0: i32, %arg1: i32) -> (i32, i32, i32, i32) {
    %c0_i32 = arith.constant 0 : i32
    %c0_i32_0 = arith.constant 0 : i32
    %c0_i32_1 = arith.constant 0 : i32
    return %arg0, %c0_i32, %arg1, %c0_i32_0 : i32, i32, i32, i32
  }
  func.func @transform_6(%arg0: i32, %arg1: i32) -> (i32, i32, i32, i32) {
    %c0_i32 = arith.constant 0 : i32
    %c0_i32_0 = arith.constant 0 : i32
    %c0_i32_1 = arith.constant 0 : i32
    return %arg0, %c0_i32, %arg1, %c0_i32_0 : i32, i32, i32, i32
  }
}

</mosaic_0001>

<bundles_post_ra>
// kernel: tpu_custom_call.1
= control target key start
LH: loop header
LB: loop body
LE: loop exit
PB: predicated region body
PF: predicated region fallthrough
CT: control target
= control target key end

     0   :  { %s1699_s0 = inlined_call_operand.hbm [shape: f32[2,8,32], index: 0, kind: input, shape index: {}]   ;;  %s1700_s1 = inlined_call_operand.hbm [shape: f32[4,8,32], index: 1, kind: input, shape index: {}]   ;;  %s1701_s2 = inlined_call_operand.hbm [shape: f32[4,8,32], index: 2, kind: input, shape index: {}]   ;;  %s1702_s3 = inlined_call_operand.hbm [shape: f32[4,8,32], index: 3, kind: input, shape index: {}]   ;;  %s1703_s4 = inlined_call_operand.hbm [shape: f32[2,4,8,8], index: 4, kind: output, shape index: {0}]   ;;  %s1704_s5 = inlined_call_operand.hbm [shape: f32[2,4,8,8], index: 5, kind: output, shape index: {1}]   ;;  %s1705_s6 = inlined_call_operand.hbm [shape: f32[2,4,8,8], index: 6, kind: output, shape index: {2}]  }
   0x1   :  { %1707 = sst [smem:[#allocation19_spill]] %s1699_s0 }
   0x2   :  { %1708 = sst [smem:[#allocation20_spill]] %s1700_s1 }
   0x3   :  { %1709 = sst [smem:[#allocation21_spill]] %s1701_s2 }
   0x4   :  { %1710 = sst [smem:[#allocation22_spill]] %s1702_s3 }
   0x5   :  { %12 = vsyncpa [#allocation3], 0 }
   0x6   :  { %14 = vsyncpa [#allocation3 + $0x1], 0 }
   0x7   :  { %15 = vsyncpa [#allocation6], 0 }
   0x8   :  { %16 = vsyncpa [#allocation9], 0 }
   0x9   :  { %17 = vsyncpa [#allocation4], 0 }
   0xa   :  { %19 = vsyncpa [#allocation4 + $0x1], 0 }
   0xb   :  { %20 = vsyncpa [#allocation12], 0 }
   0xc   :  { %22 = vsyncpa [#allocation12 + $0x1], 0  ;;  %s1410_s21 = smov 0   ;;  %s1412_s22 = smov 0  }
   0xd   :  { %s1414_s23 = smov 0   ;;  %s1416_s24 = smov 0  }
   0xe   :  { %s1418_s25 = smov 0   ;;  %s1420_s26 = smov 0  }
   0xf LB: > { %s1441_s27 = sadd.s32 4294967295, %s1366_s26   ;;  %p927_p0 = scmp.ge.s32.totalorder %s1366_s26, 1  ;;  %s1366_s26 = sphi %s1420_s26, %s28_s26   ;;  %s1362_s25 = sphi %s1418_s25, %s1727_s25   ;;  %s1358_s24 = sphi %s1416_s24, %s1726_s24   ;;  %s1354_s23 = sphi %s1414_s23, %s1725_s23   ;;  %s1350_s22 = sphi %s1412_s22, %s1724_s22   ;;  %s1346_s21 = sphi %s1410_s21, %s1723_s21  }
  0x10   : > { %p63_p1 = scmp.eq.s32.totalorder %s1441_s27, 0  ;;  %p220_p2 = scmp.lt.s32.totalorder %s1366_s26, 3 }
  0x11   : > { %s1711_s1 = sld [smem:[#allocation20_spill]]  ;;  %s1368_s8 = smov [#allocation5]  }
  0x12   : > { %p1449_p3 = pnand %p927_p0, %p220_p2  ;;  %s233_s9 = sshll.u32 %s1368_s8, 4  ;;  %s234_s9 = int_to_ptr.vmem [resolvable:$true] %s233_s9 }
  0x13   : > { %p931_p6 = scmp.ge.s32.totalorder %s1366_s26, 2  ;;  %s1714_s2 = sld [smem:[#allocation21_spill]] }
  0x14   : > { %p1009_p4 = pneg %p1449_p3  ;;  %s1369_s14 = smov 128  }
  0x15   : > { %s1370_s15 = smov 8   ;;  %s1371_s16 = smov [#allocation7]  }
  0x16   : > { %p1457_p5 = pnand %p1009_p4, %p63_p1  ;;  %s247_s17 = sshll.u32 %s1371_s16, 4  ;;  %s248_s17 = int_to_ptr.vmem [resolvable:$true] %s247_s17 }
  0x17   : > { %s231_s30 = sshll.u32 %s1711_s1, 4  ;;  %s1715_s3 = sld [smem:[#allocation22_spill]]  ;;  %s232_s30 = int_to_ptr.hbm [resolvable:$true] %s231_s30 }
  0x18   : > { %1012 = dma.hbm_to_vmem [thread:$0]  (!%p1457_p5), %s232_s30, 512, %s234_s9, [#allocation6], %s1369_s14, %s1369_s14, %s1370_s15  }
  0x19   : > { %s245_s13 = sshll.u32 %s1714_s2, 4  ;;  %s1372_s28 = smov [#allocation8]   ;;  %s246_s13 = int_to_ptr.hbm [resolvable:$true] %s245_s13 }
  0x1a   : > { %1015 = dma.hbm_to_vmem [thread:$0]  (!%p1457_p5), %s246_s13, 512, %s248_s17, [#allocation6], %s1369_s14, %s1369_s14, %s1370_s15  }
  0x1b   : > { %s261_s29 = sshll.u32 %s1372_s28, 4  ;;  %s1706_s30 = sadd.s32 4294967294, %s1366_s26   ;;  %s262_s29 = int_to_ptr.vmem [resolvable:$true] %s261_s29 }
  0x1c   : > { %s40_s8 = sadd.s32 1, %s1362_s25  ;;  %s49_s9 = sadd.s32 1, %s1354_s23 }
  0x1d   : > { %s259_s20 = sshll.u32 %s1715_s3, 4  ;;  %p42_p7 = scmp.ge.s32.totalorder %s40_s8, 2  ;;  %s260_s20 = int_to_ptr.hbm [resolvable:$true] %s259_s20 }
  0x1e   : > { %1018 = dma.hbm_to_vmem [thread:$0]  (!%p1457_p5), %s260_s20, 512, %s262_s29, [#allocation9], %s1369_s14, %s1369_s14, %s1370_s15  }
  0x1f   : > { %p56_p8 = scmp.ne.s32.totalorder %s1354_s23, %s1350_s22  ;;  %p57_p9 = scmp.eq.s32.totalorder %s1366_s26, 0 }
  0x20   : > { %p62_p10 = scmp.ne.s32.totalorder %s1350_s22, %s1346_s21  ;;  %s1729_s8 = smov (%p42_p7, %s40_s8), 0 }
  0x21   : > { %p1484_p11 = por %p57_p9, %p56_p8  ;;  %s44_s12 = ssub.s32 %s1362_s25, %s1729_s8 }
  0x22   : > { %p1490_p12 = por %p63_p1, %p62_p10  ;;  %p151_p13 = scmp.eq.s32.totalorder %s1441_s27, 1 }
  0x23   : > { %p47_p0 = scmp.eq.s32.totalorder %s44_s12, 0  ;;  %p157_p2 = scmp.eq.s32.totalorder %s1706_s30, 1 }
  0x24   : > { %p1499_p4 = por %p151_p13, %p56_p8  ;;  %p1036_p5 = scmp.lt.s32.totalorder %s1366_s26, 2 }
  0x25   : > { %s1505_s14 = scalar_select %p47_p0, %s1354_s23, %s49_s9  }
  0x26   : > { %p1507_p7 = por %p157_p2, %p62_p10  ;;  %s275_s16 = sand.u32 1, %s1354_s23  }
  0x27   : > { %s932_s17 = sshll.u32 %s275_s16, 3  ;;  %s933_s18 = sshll.u32 %s1362_s25, 3 }
  0x28   : > { %s1720_s0 = sld [smem:[#allocation19_spill]]  ;;  %s279_s29 = scalar_lea.vmem [#allocation2], %s932_s17 }
  0x29   : > { %s288_s12 = sshll.u32 %s279_s29, 4  ;;  %p1020_p8 = pnand %p1036_p5, %p1484_p11  ;;  %s289_s12 = int_to_ptr.vmem [resolvable:$true] %s288_s12 }
  0x2a   : > { %s276_s9 = scalar_lea.sflag [#allocation3], %s275_s16  ;;  %s1521_s1 = sand.u32 (!%p1449_p3), 1, %s1350_s22  }
  0x2b   : > { %s935_s19 = sshll.u32 (!%p1449_p3), %s1521_s1, 3 }
  0x2c   : > { %297 = sbr.rel (%p1449_p3) target bundleno = 232 (0xe8), region = 36  ;;  %s303_s17 = scalar_lea.vmem (!%p1449_p3), [#allocation2], %s935_s19 }
  0x2e   : > { %s284_s28 = scalar_lea.hbm %s1720_s0, %s933_s18  ;;  %s300_s18 = scalar_lea.sflag (!%p1449_p3), [#allocation3], %s1521_s1 }
  0x2f   : > { %s286_s30 = sshll.u32 %s284_s28, 4  ;;  %s287_s30 = int_to_ptr.hbm [resolvable:$true] %s286_s30 }
  0x30   : > { %1022 = dma.hbm_to_vmem [thread:$0]  (!%p1020_p8), %s287_s30, 128, %s289_s12, %s276_s9  }
  0x31   : > { %1325 = dma.done.wait (%p1490_p12), %s300_s18, 128  }
  0x32   : > { %1327 = vsyncadd (%p1490_p12), %s300_s18, 4294967168 }
  0x33   : > { %1329 = dma.done.wait (%p63_p1), [#allocation6], 1024  }
  0x34   : > { %1331 = vsyncadd (%p63_p1), [#allocation6], 4294966272 }
  0x35   : > { %1333 = dma.done.wait (%p63_p1), [#allocation9], 512  }
  0x36   : > { %1335 = vsyncadd (%p63_p1), [#allocation9], 4294966784  ;;  %vm360_vm0 = vcmask 261120   ;;  %v414_v0 = vld [vmem:[#allocation8] sm:$0xff]  ;;  %v440_v1 = vld [vmem:[#allocation5 + $0x8] sm:$0xff]  ;;  %s939_s7 = sshll.u32 %s1521_s1, 5 }
  0x37   : > { %v358_v2 = vld [vmem:[%s303_s17] sm:$0xff]  ;;  %946 = vmatpush.xpose.msk.msra.mxu2 %vm360_vm0, %v414_v0  ;;  %948 = vmatpush.xpose.msk.msra.mxu3 %vm360_vm0, %v440_v1  ;;  %v359_v5 = vld [vmem:[#allocation5] sm:$0xff]  ;;  %v467_v7 = vld [vmem:[#allocation7 + $0x8] sm:$0xff]  ;;  %vm387_vm1 = vcmask 64512   ;;  %s1562_s30 = scalar_lea.vmem [#allocation10], %s939_s7  ;;  %s1566_s11 = scalar_lea.vmem [#allocation11], %s939_s7 }
  0x38   : > { %v521_v3 = vld [vmem:[#allocation5 + $0x10] sm:$0xff]  ;;  %v389_v6 = vld [vmem:[#allocation7] sm:$0xff]  ;;  %v494_v8 = vld [vmem:[#allocation8 + $0x8] sm:$0xff]  ;;  %942 = vmatpush.xpose.msk.msra.mxu0 %vm360_vm0, %v359_v5  ;;  %s1570_s10 = scalar_lea.vmem [#allocation13], %s939_s7  ;;  %s986_s16 = sshll.u32 %s1358_s24, 5 }
  0x39   : > { %v548_v4 = vld [vmem:[#allocation7 + $0x10] sm:$0xff]  ;;  %944 = vmatpush.xpose.msk.msra.mxu1 %vm360_vm0, %v389_v6  ;;  %v629_v9 = vld [vmem:[#allocation7 + $0x18] sm:$0xff]  ;;  %s706_s20 = sshll.u32 %s1562_s30, 4  ;;  %s705_s12 = scalar_lea.hbm %s1703_s4, %s986_s16  ;;  %s1586_s20 = int_to_ptr.vmem [resolvable:$true] %s706_s20 }
  0x3a   : > { %947 = vmatmul.msk.f32.vlgmr.msra.gmra.mxu2 %vm360_vm0, %v358_v2  ;;  %949 = vmatmul.msk.f32.vlgmr.msra.gmra.mxu3 %vm360_vm0, %v358_v2  ;;  %v656_v10 = vld [vmem:[#allocation8 + $0x18] sm:$0xff]  ;;  %v575_v11 = vld [vmem:[#allocation8 + $0x10] sm:$0xff]  ;;  %s724_s24 = sshll.u32 %s1566_s11, 4  ;;  %s1591_s19 = sshll.u32 %s705_s12, 4  ;;  %s709_s19 = int_to_ptr.hbm [resolvable:$true] %s1591_s19  ;;  %s1607_s24 = int_to_ptr.vmem [resolvable:$true] %s724_s24 }
  0x3b   : > { %957 = vmatpush.xpose.msk.msrb.mxu2 %vm360_vm0, %v521_v3  ;;  %960 = vmatpush.xpose.msk.msrb.mxu3 %vm360_vm0, %v548_v4  ;;  %v602_v12 = vld [vmem:[#allocation5 + $0x18] sm:$0xff]  ;;  %s723_s7 = scalar_lea.hbm %s1704_s5, %s986_s16  ;;  %s741_s9 = scalar_lea.hbm %s1705_s6, %s986_s16 }
  0x3c   : > { %951 = vmatpush.xpose.msk.msrb.mxu0 %vm360_vm0, %v467_v7  ;;  %945 = vmatmul.msk.f32.vlgmr.msra.gmra.mxu1 %vm360_vm0, %v358_v2  ;;  %s687_s0 = sand.u32 1, %s1441_s27   ;;  %s1605_s12 = sshll.u32 %s723_s7, 4  ;;  %s727_s12 = int_to_ptr.hbm [resolvable:$true] %s1605_s12 }
  0x3d   : > { %954 = vmatpush.xpose.msk.msrb.mxu1 %vm360_vm0, %v494_v8  ;;  %943 = vmatmul.msk.f32.vlgmr.msra.gmra.mxu0 %vm360_vm0, %v358_v2  ;;  %s1611_s2 = sshll.u32 %s741_s9, 4  ;;  %s683_s18 = scalar_lea.sflag [#allocation4], %s1521_s1  ;;  %s745_s2 = int_to_ptr.hbm [resolvable:$true] %s1611_s2 }
  0x3e   : > { %s1230_s17 = sshra.s32 %s709_s19, 4  ;;  %s1236_s27 = scalar_lea.hbm %s1703_s4, 64  ;;  %s1231_s17 = int_to_ptr.hbm [resolvable:$true] %s1230_s17 }
  0x3f   : > { %969 = vmatpush.xpose.msk.msra.mxu2 %vm360_vm0, %v629_v9  ;;  %972 = vmatpush.xpose.msk.msra.mxu3 %vm360_vm0, %v656_v10  ;;  %s1232_s28 = scalar_lea.hbm %s1231_s17, 32  ;;  %p1237_p10 = scmp.lt.s32.totalorder %s1231_s17, %s1703_s4 }
  0x40   : > { %963 = vmatpush.xpose.msk.msra.mxu0 %vm360_vm0, %v575_v11  ;;  %p1233_p1 = scmp.ne.s32.totalorder %s1231_s17, %s1232_s28  ;;  %p1238_p11 = scmp.lt.s32.totalorder %s1236_s27, %s1232_s28 }
  0x41   : > { %966 = vmatpush.xpose.msk.msra.mxu1 %vm360_vm0, %v602_v12 }
  0x42   : > { %958 = vmatmul.msk.f32.vlgmr.msrb.gmra.mxu2 %vm360_vm0, %v358_v2  ;;  %961 = vmatmul.msk.f32.vlgmr.msrb.gmra.mxu3 %vm360_vm0, %v358_v2  ;;  %p1234_p3 = pnand %p1233_p1, %p1499_p4  ;;  %p1239_p12 = por %p1238_p11, %p1237_p10 }
  0x44   : > { %955 = vmatmul.msk.f32.vlgmr.msrb.gmra.mxu1 %vm360_vm0, %v358_v2  ;;  %p1235_p9 = pneg %p1234_p3 }
  0x45   : > { %952 = vmatmul.msk.f32.vlgmr.msrb.gmra.mxu0 %vm360_vm0, %v358_v2 }
  0x46   : > { %p1240_p13 = pnand %p1239_p12, %p1235_p9 }
  0x4a   : > { %970 = vmatmul.msk.f32.vlgmr.msra.gmra.mxu2 %vm360_vm0, %v358_v2  ;;  %973 = vmatmul.msk.f32.vlgmr.msra.gmra.mxu3 %vm360_vm0, %v358_v2 }
  0x4c   : > { %967 = vmatmul.msk.f32.vlgmr.msra.gmra.mxu1 %vm360_vm0, %v358_v2 }
  0x4d   : > { %964 = vmatmul.msk.f32.vlgmr.msra.gmra.mxu0 %vm360_vm0, %v358_v2 }
  0xb9   : > { %v410_v14 = vpop.f32.mrf.mxu1 }
  0xba   : > { %v384_v13 = vpop.f32.mrf.mxu0  ;;  %413 = vst.msk [vmem:[%s1566_s11] sm:$0xff] %vm387_vm1, %v410_v14 }
  0xbb   : > { %388 = vst.msk [vmem:[%s1562_s30] sm:$0xff] %vm387_vm1, %v384_v13 }
  0xbd   : > { %v435_v15 = vpop.f32.mrf.mxu2  ;;  %v461_v16 = vpop.f32.mrf.mxu3 }
  0xbe   : > { %438 = vst.msk [vmem:[%s1570_s10] sm:$0xff] %vm387_vm1, %v435_v15 }
  0xbf   : > { %950 = vst.msk [vmem:[%s1562_s30 + $0x8] sm:$0xff] %vm387_vm1, %v461_v16 }
  0xc1   : > { %v515_v18 = vpop.f32.mrf.mxu1 }
  0xc2   : > { %v488_v17 = vpop.f32.mrf.mxu0  ;;  %956 = vst.msk [vmem:[%s1570_s10 + $0x8] sm:$0xff] %vm387_vm1, %v515_v18 }
  0xc3   : > { %953 = vst.msk [vmem:[%s1566_s11 + $0x8] sm:$0xff] %vm387_vm1, %v488_v17 }
  0xc5   : > { %v542_v19 = vpop.f32.mrf.mxu2  ;;  %v569_v20 = vpop.f32.mrf.mxu3 }
  0xc6   : > { %959 = vst.msk [vmem:[%s1562_s30 + $0x10] sm:$0xff] %vm387_vm1, %v542_v19 }
  0xc7   : > { %962 = vst.msk [vmem:[%s1566_s11 + $0x10] sm:$0xff] %vm387_vm1, %v569_v20 }
  0xc9   : > { %v623_v22 = vpop.f32.mrf.mxu1 }
  0xca   : > { %v596_v21 = vpop.f32.mrf.mxu0  ;;  %968 = vst.msk [vmem:[%s1562_s30 + $0x18] sm:$0xff] %vm387_vm1, %v623_v22 }
  0xcb   : > { %965 = vst.msk [vmem:[%s1570_s10 + $0x10] sm:$0xff] %vm387_vm1, %v596_v21 }
  0xcc   : > { %1243 = shalt.err (!%p1240_p13)
}
  0xcd   : > { %s1373_s1 = smov 128   ;;  %s1374_s30 = smov 8   ;;  %v650_v23 = vpop.f32.mrf.mxu2  ;;  %v677_v24 = vpop.f32.mrf.mxu3 }
  0xce   : > { %1003 = dma.vmem_to_hbm [thread:$0]  (%p1499_p4), %s1586_s20, 512, %s709_s19, %s683_s18, %s1373_s1, %s1373_s1, %s1374_s30  }
  0xcf   : > { %s1721_s3 = sshll.u32 %s1570_s10, 4  ;;  %971 = vst.msk [vmem:[%s1566_s11 + $0x18] sm:$0xff] %vm387_vm1, %v650_v23  ;;  %s1638_s9 = scalar_lea.sflag [#allocation12], %s687_s0  ;;  %s1631_s3 = int_to_ptr.vmem [resolvable:$true] %s1721_s3 }
  0xd0   : > { %974 = vst.msk [vmem:[%s1570_s10 + $0x18] sm:$0xff] %vm387_vm1, %v677_v24  ;;  %s1258_s17 = sshra.s32 %s727_s12, 4  ;;  %s1264_s18 = scalar_lea.hbm %s1704_s5, 64  ;;  %s1259_s17 = int_to_ptr.hbm [resolvable:$true] %s1258_s17 }
  0xd1   : > { %s1260_s28 = scalar_lea.hbm %s1259_s17, 32  ;;  %p1265_p8 = scmp.lt.s32.totalorder %s1259_s17, %s1704_s5 }
  0xd2   : > { %p1261_p0 = scmp.ne.s32.totalorder %s1259_s17, %s1260_s28  ;;  %p1266_p1 = scmp.lt.s32.totalorder %s1264_s18, %s1260_s28 }
  0xd4   : > { %p1262_p2 = pnand %p1261_p0, %p1499_p4  ;;  %p1267_p3 = por %p1266_p1, %p1265_p8 }
  0xd6   : > { %p1263_p5 = pneg %p1262_p2 }
  0xd8   : > { %p1268_p9 = pnand %p1267_p3, %p1263_p5 }
  0xda   : > { %1271 = shalt.err (!%p1268_p9)
}
  0xdb   : > { %1004 = dma.vmem_to_hbm [thread:$0]  (%p1499_p4), %s1607_s24, 512, %s727_s12, %s1638_s9, %s1373_s1, %s1373_s1, %s1374_s30  }
  0xdc   : > { %s1286_s0 = sshra.s32 %s745_s2, 4  ;;  %s1292_s7 = scalar_lea.hbm %s1705_s6, 64  ;;  %s1287_s0 = int_to_ptr.hbm [resolvable:$true] %s1286_s0 }
  0xdd   : > { %s1288_s11 = scalar_lea.hbm %s1287_s0, 32  ;;  %p1293_p13 = scmp.lt.s32.totalorder %s1287_s0, %s1705_s6 }
  0xde   : > { %p1289_p10 = scmp.ne.s32.totalorder %s1287_s0, %s1288_s11  ;;  %p1294_p0 = scmp.lt.s32.totalorder %s1292_s7, %s1288_s11 }
  0xe0   : > { %p1290_p11 = pnand %p1289_p10, %p1499_p4  ;;  %p1295_p2 = por %p1294_p0, %p1293_p13 }
  0xe2   : > { %p1291_p12 = pneg %p1290_p11 }
  0xe4   : > { %p1296_p5 = pnand %p1295_p2, %p1291_p12 }
  0xe6   : > { %1299 = shalt.err (!%p1296_p5)
}
  0xe7   : > { %1005 = dma.vmem_to_hbm [thread:$0]  (%p1499_p4), %s1631_s3, 512, %s745_s2, %s1638_s9, %s1373_s1, %s1373_s1, %s1374_s30  }
  0xe8 PF: > { %s759_s24 = sand.u32 1, %s1346_s21   ;;  %p1024_p8 = pnand %p931_p6, %p1507_p7 }
  0xe9   : > { %s760_s12 = scalar_lea.sflag [#allocation4], %s759_s24 }
  0xea   : > { %p1025_p1 = pneg %p1024_p8 }
  0xec   : > { %1337 = dma.done.wait (%p1025_p1), %s760_s12, 512  }
  0xed   : > { %1339 = vsyncadd (%p1025_p1), %s760_s12, 4294966784  ;;  %s1722_s13 = sadd.s32 4294967294, %s1366_s26  }
  0xee   : > { %s769_s20 = sand.u32 1, %s1722_s13  }
  0xef   : > { %s770_s19 = scalar_lea.sflag [#allocation12], %s769_s20 }
  0xf0   : > { %1341 = dma.done.wait (%p1025_p1), %s770_s19, 1024  }
  0xf1   : > { %1343 = vsyncadd (%p1025_p1), %s770_s19, 4294966272  ;;  %s28_s26 = sadd.s32 1, %s1366_s26   ;;  %s1723_s21 = smov %s1350_s22 }
  0xf2   : > { %p25_p4 = scmp.ge.s32.totalorder %s28_s26, 4   ;;  %s1724_s22 = smov %s1354_s23 }
  0xf3   : > { %s1725_s23 = smov %s1505_s14  ;;  %s1726_s24 = smov %s1362_s25 }
  0xf4   : > { %s1727_s25 = smov %s1729_s8  ;;  %27 = sbr.rel (!%p25_p4) target bundleno = 15 (0xf), region = 143 }
  0xf9   :  { %786 = vsyncpa [#allocation3], 1 }
  0xfa   :  { %788 = vsyncpa [#allocation3 + $0x1], 1 }
  0xfb   :  { %789 = vsyncpa [#allocation6], 1 }
  0xfc   :  { %790 = vsyncpa [#allocation9], 1 }
  0xfd   :  { %791 = vsyncpa [#allocation4], 1 }
  0xfe   :  { %793 = vsyncpa [#allocation4 + $0x1], 1 }
  0xff   :  { %794 = vsyncpa [#allocation12], 1 }
 0x100   :  { %796 = vsyncpa [#allocation12 + $0x1], 1 }

</bundles_post_ra>
